<compile_context>
chip_gen: v7x
topology: tpu7x:2x2x1
jax: 0.10.0
libtpu: 0.0.40
codegen_flags: <defaults>
</compile_context>

<pallas_src>
import functools

import jax
import jax.numpy as jnp
from jax.experimental import pallas as pl
from jax.experimental.pallas import tpu as pltpu


def _round_up(x, m):
    return (x + m - 1) // m * m


def _make_vq_kernel(bf16_dist: bool):
    def vq_kernel(z_ref, cb_ref, cbt_ref, cb2_ref, zq_ref, idx_ref, err_ref):
        # z_ref  : (e_dim, tn)   channel-major token tile (tokens on lanes)
        # cb_ref : (n_e, e_dim)  codebook
        # cbt_ref: (e_dim, n_e)  codebook transposed (precomputed, tiny)
        # cb2_ref: (n_e, 1)      0.5 * ||codebook_row||^2 (precomputed)
        z = z_ref[...]
        cb = cb_ref[...]
        cbt = cbt_ref[...]

        # argmin_e ||z_t - cb_e||^2 == argmin_e (0.5*||cb_e||^2 - <cb_e, z_t>)
        # (per-token ||z_t||^2 constant dropped, -2 folded into the hoisted cb2)
        if bf16_dist:
            # v6e/v7x: bf16-native MXU for the distance matmul (optional; can
            # flip near-tie argmins relative to the f32 reference).
            prod = jnp.dot(cb.astype(jnp.bfloat16), z.astype(jnp.bfloat16),
                           preferred_element_type=jnp.float32)
        else:
            prod = jnp.dot(cb, z.astype(jnp.float32),
                           preferred_element_type=jnp.float32)
        score = cb2_ref[...] - prod                       # (n_e, tn)

        # first-min argmin over the codebook axis (matches torch.argmin tie-break)
        n_e = score.shape[0]
        row = jax.lax.broadcasted_iota(jnp.int32, score.shape, 0)   # (n_e, tn)
        min_s = jnp.min(score, axis=0, keepdims=True)               # (1, tn)
        idx = jnp.min(jnp.where(score == min_s, row, n_e),
                      axis=0, keepdims=True)                        # (1, tn) int32

        # one-hot gather via MXU (matches scatter_ + matmul in the reference)
        onehot = (row == idx).astype(jnp.float32)                   # (n_e, tn)
        zq = jnp.dot(cbt, onehot, preferred_element_type=jnp.float32)  # (e_dim, tn)

        zq_ref[...] = zq.astype(zq_ref.dtype)
        idx_ref[...] = idx

        # per-token squared error (channel-summed); final reduce happens in the
        # wrapper -> no revisited scalar output, grid fully parallel.
        diff = zq - z.astype(jnp.float32)
        err_ref[...] = jnp.sum(diff * diff, axis=0, keepdims=True)  # (1, tn)

    return vq_kernel


@functools.partial(jax.jit, static_argnames=("beta", "tn", "bf16_dist"))
def vector_quantizer_forward(z_nchw, codebook, beta=0.25, tn=512, bf16_dist=False):
    """Mirrors VectorQuantizer.forward (gt_indices=None, LQ_stage=False).

    Returns (z_q [B,C,H,W], codebook_loss scalar, indices [B,1,H,W] int32).
    """
    B, C, H, W = z_nchw.shape
    n_e, e_dim = codebook.shape
    assert C == e_dim
    HW = H * W

    # token-tile size: large (overhead-amortizing) but clamped to the padded
    # token count; pad the token axis instead of asserting divisibility.
    tn = min(int(tn), _round_up(HW, 128))
    hw_pad = _round_up(HW, tn)

    # NCHW -> (B, e_dim, HW): pure reshape, no transpose round trips.
    z3 = z_nchw.reshape(B, C, HW)
    if hw_pad != HW:
        z3 = jnp.pad(z3, ((0, 0), (0, 0), (0, hw_pad - HW)))

    cb = codebook.astype(jnp.float32)
    cbt = cb.T                                               # (e_dim, n_e), tiny
    cb2_half = 0.5 * jnp.sum(cb * cb, axis=1, keepdims=True)  # (n_e, 1), hoisted

    grid = (B, hw_pad // tn)

    zq, idx, err = pl.pallas_call(
        _make_vq_kernel(bf16_dist),
        out_shape=(
            jax.ShapeDtypeStruct((B, e_dim, hw_pad), z_nchw.dtype),
            jax.ShapeDtypeStruct((B, 1, hw_pad), jnp.int32),
            jax.ShapeDtypeStruct((B, 1, hw_pad), jnp.float32),
        ),
        grid_spec=pltpu.PrefetchScalarGridSpec(
            num_scalar_prefetch=0,
            grid=grid,
            in_specs=[
                pl.BlockSpec((None, e_dim, tn), lambda b, i: (b, 0, i)),  # z tile
                pl.BlockSpec((n_e, e_dim), lambda b, i: (0, 0)),          # codebook
                pl.BlockSpec((e_dim, n_e), lambda b, i: (0, 0)),          # codebook^T
                pl.BlockSpec((n_e, 1), lambda b, i: (0, 0)),              # 0.5*||cb||^2
            ],
            out_specs=[
                pl.BlockSpec((None, e_dim, tn), lambda b, i: (b, 0, i)),  # z_q tile
                pl.BlockSpec((None, 1, tn), lambda b, i: (b, 0, i)),      # indices
                pl.BlockSpec((None, 1, tn), lambda b, i: (b, 0, i)),      # per-token SSE
            ],
        ),
        compiler_params=pltpu.CompilerParams(
            dimension_semantics=("parallel", "parallel")),
    )(z3, cb, cbt, cb2_half)

    # slice off token padding; reshape back to NCHW (no transpose needed).
    z_q = zq[:, :, :HW].reshape(B, C, H, W)
    indices = idx[:, 0, :HW].reshape(B, 1, H, W)

    sse = jnp.sum(err[:, 0, :HW])
    mse = sse / jnp.float32(B * HW * e_dim)
    # q_latent_loss + beta * e_latent_loss; both equal mean((z_q - z)^2) in value.
    codebook_loss = (1.0 + beta) * mse
    # TODO(synk): forward-only. The stop_gradient split (straight-through
    # estimator, commitment vs codebook gradients) and the LQ_stage/gt_indices
    # gram-loss branch are not reproduced here.
    return z_q, codebook_loss, indices


if __name__ == "__main__":
    # Module hyperparameters (synthetic, deterministic init)
    n_e = 128        # number of embeddings
    e_dim = 32       # embedding dimension
    beta = 0.25

    B, H, W = 2, 16, 16
    key = jax.random.PRNGKey(0)
    k_z, k_emb = jax.random.split(key)

    # nn.Embedding(n_e, e_dim).weight.data.uniform_(-1/n_e, 1/n_e)
    codebook = jax.random.uniform(
        k_emb, (n_e, e_dim), dtype=jnp.float32,
        minval=-1.0 / n_e, maxval=1.0 / n_e)

    z = jax.random.normal(k_z, (B, e_dim, H, W), dtype=jnp.float32)

    z_q, loss, idx = vector_quantizer_forward(z, codebook, beta=beta)
    jax.block_until_ready((z_q, loss, idx))

    assert z_q.shape == (B, e_dim, H, W)
    assert idx.shape == (B, 1, H, W)
    assert loss.shape == ()
    assert bool(jnp.isfinite(loss))
    assert bool(jnp.all(jnp.isfinite(z_q)))
    assert bool(jnp.all((idx >= 0) & (idx < n_e)))
    print("KERNEL_OK")
</pallas_src>

<mosaic_0001>
module attributes {stable_mosaic.version = 11 : i64} {
  func.func @vq_kernel(%arg0: i32, %arg1: i32, %arg2: memref<1x32x256xf32, #tpu.memory_space<vmem>>, %arg3: memref<128x32xf32, #tpu.memory_space<vmem>>, %arg4: memref<32x128xf32, #tpu.memory_space<vmem>>, %arg5: memref<128x1xf32, #tpu.memory_space<vmem>>, %arg6: memref<1x32x256xf32, #tpu.memory_space<vmem>>, %arg7: memref<1x1x256xi32, #tpu.memory_space<vmem>>, %arg8: memref<1x1x256xf32, #tpu.memory_space<vmem>>) attributes {dimension_semantics = [#tpu.dimension_semantics<parallel>, #tpu.dimension_semantics<parallel>], iteration_bounds = array<i64: 2, 1>, scalar_prefetch = 0 : i64, scratch_operands = 0 : i64, tpu.core_type = #tpu.core_type<tc>, window_params = [{transform_indices = @transform_0, window_bounds = array<i64: 1, 32, 256>}, {pipeline_mode = #tpu.pipeline_mode<synchronous>, transform_indices = @transform_1, window_bounds = array<i64: 128, 32>}, {pipeline_mode = #tpu.pipeline_mode<synchronous>, transform_indices = @transform_2, window_bounds = array<i64: 32, 128>}, {pipeline_mode = #tpu.pipeline_mode<synchronous>, transform_indices = @transform_3, window_bounds = array<i64: 128, 1>}, {transform_indices = @transform_4, window_bounds = array<i64: 1, 32, 256>}, {transform_indices = @transform_5, window_bounds = array<i64: 1, 1, 256>}, {transform_indices = @transform_6, window_bounds = array<i64: 1, 1, 256>}]} {
    %c0 = arith.constant 0 : index
    %c0_0 = arith.constant 0 : index
    %c0_1 = arith.constant 0 : index
    %0 = vector.load %arg2[%c0, %c0_0, %c0_1] : memref<1x32x256xf32, #tpu.memory_space<vmem>>, vector<1x32x256xf32>
    %1 = vector.shape_cast %0 : vector<1x32x256xf32> to vector<32x256xf32>
    %c0_2 = arith.constant 0 : index
    %c0_3 = arith.constant 0 : index
    %2 = vector.load %arg3[%c0_2, %c0_3] : memref<128x32xf32, #tpu.memory_space<vmem>>, vector<128x32xf32>
    %c0_4 = arith.constant 0 : index
    %c0_5 = arith.constant 0 : index
    %3 = vector.load %arg4[%c0_4, %c0_5] : memref<32x128xf32, #tpu.memory_space<vmem>>, vector<32x128xf32>
    %cst = arith.constant dense<0.000000e+00> : vector<128x256xf32>
    %4 = tpu.matmul %2, %1, %cst {dimension_numbers = #tpu.dot_dimension_numbers<[1], [0], [0], [1], [0, 0, 1, 1], [], []>} : vector<128x32xf32>, vector<32x256xf32>, vector<128x256xf32> -> vector<128x256xf32>
    %c0_6 = arith.constant 0 : index
    %c0_7 = arith.constant 0 : index
    %5 = vector.load %arg5[%c0_6, %c0_7] : memref<128x1xf32, #tpu.memory_space<vmem>>, vector<128x1xf32>
    %6 = vector.broadcast %5 : vector<128x1xf32> to vector<128x256xf32>
    %7 = arith.subf %6, %4 : vector<128x256xf32>
    %8 = tpu.iota {dimensions = array<i32: 0>} : vector<128x256xi32>
    %cst_8 = arith.constant dense<0x7F800000> : vector<256xf32>
    %9 = vector.multi_reduction <minimumf>, %7, %cst_8 [0] : vector<128x256xf32> to vector<256xf32>
    %10 = vector.shape_cast %9 : vector<256xf32> to vector<1x256xf32>
    %11 = vector.broadcast %10 : vector<1x256xf32> to vector<128x256xf32>
    %12 = arith.cmpf oeq, %7, %11 : vector<128x256xf32>
    %c128_i32 = arith.constant 128 : i32
    %13 = vector.broadcast %c128_i32 : i32 to vector<128x256xi32>
    %14 = arith.select %12, %8, %13 : vector<128x256xi1>, vector<128x256xi32>
    %cst_9 = arith.constant dense<2147483647> : vector<256xi32>
    %15 = vector.multi_reduction <minsi>, %14, %cst_9 [0] : vector<128x256xi32> to vector<256xi32>
    %16 = vector.shape_cast %15 : vector<256xi32> to vector<1x256xi32>
    %17 = vector.broadcast %16 : vector<1x256xi32> to vector<128x256xi32>
    %18 = arith.cmpi eq, %8, %17 : vector<128x256xi32>
    %19 = arith.extui %18 : vector<128x256xi1> to vector<128x256xi32>
    %20 = arith.sitofp %19 : vector<128x256xi32> to vector<128x256xf32>
    %cst_10 = arith.constant dense<0.000000e+00> : vector<32x256xf32>
    %21 = tpu.matmul %3, %20, %cst_10 {dimension_numbers = #tpu.dot_dimension_numbers<[1], [0], [0], [1], [0, 0, 1, 1], [], []>} : vector<32x128xf32>, vector<128x256xf32>, vector<32x256xf32> -> vector<32x256xf32>
    %c0_11 = arith.constant 0 : index
    %c0_12 = arith.constant 0 : index
    %c0_13 = arith.constant 0 : index
    %22 = vector.load %arg6[%c0_11, %c0_12, %c0_13] : memref<1x32x256xf32, #tpu.memory_space<vmem>>, vector<1x32x256xf32>
    %23 = vector.shape_cast %22 : vector<1x32x256xf32> to vector<32x256xf32>
    %24 = vector.shape_cast %21 : vector<32x256xf32> to vector<1x32x256xf32>
    tpu.vector_store %arg6[%c0_11, %c0_12, %c0_13], %24 {strides = array<i32>} : memref<1x32x256xf32, #tpu.memory_space<vmem>>, vector<1x32x256xf32>,
    %c0_14 = arith.constant 0 : index
    %c0_15 = arith.constant 0 : index
    %c0_16 = arith.constant 0 : index
    %25 = vector.load %arg7[%c0_14, %c0_15, %c0_16] : memref<1x1x256xi32, #tpu.memory_space<vmem>>, vector<1x1x256xi32>
    %26 = vector.shape_cast %25 : vector<1x1x256xi32> to vector<1x256xi32>
    %27 = vector.shape_cast %16 : vector<1x256xi32> to vector<1x1x256xi32>
    tpu.vector_store %arg7[%c0_14, %c0_15, %c0_16], %27 {strides = array<i32>} : memref<1x1x256xi32, #tpu.memory_space<vmem>>, vector<1x1x256xi32>,
    %28 = arith.subf %21, %1 : vector<32x256xf32>
    %29 = arith.mulf %28, %28 : vector<32x256xf32>
    %cst_17 = arith.constant dense<0.000000e+00> : vector<256xf32>
    %30 = vector.multi_reduction <add>, %29, %cst_17 [0] : vector<32x256xf32> to vector<256xf32>
    %31 = vector.shape_cast %30 : vector<256xf32> to vector<1x256xf32>
    %c0_18 = arith.constant 0 : index
    %c0_19 = arith.constant 0 : index
    %c0_20 = arith.constant 0 : index
    %32 = vector.load %arg8[%c0_18, %c0_19, %c0_20] : memref<1x1x256xf32, #tpu.memory_space<vmem>>, vector<1x1x256xf32>
    %33 = vector.shape_cast %32 : vector<1x1x256xf32> to vector<1x256xf32>
    %34 = vector.shape_cast %31 : vector<1x256xf32> to vector<1x1x256xf32>
    tpu.vector_store %arg8[%c0_18, %c0_19, %c0_20], %34 {strides = array<i32>} : memref<1x1x256xf32, #tpu.memory_space<vmem>>, vector<1x1x256xf32>,
    return
  }
  func.func @transform_0(%arg0: i32, %arg1: i32) -> (i32, i32, i32) {
    %c0_i32 = arith.constant 0 : i32
    %c0_i32_0 = arith.constant 0 : i32
    return %arg0, %c0_i32, %arg1 : i32, i32, i32
  }
  func.func @transform_1(%arg0: i32, %arg1: i32) -> (i32, i32) {
    %c0_i32 = arith.constant 0 : i32
    %c0_i32_0 = arith.constant 0 : i32
    %c0_i32_1 = arith.constant 0 : i32
    return %c0_i32, %c0_i32_0 : i32, i32
  }
  func.func @transform_2(%arg0: i32, %arg1: i32) -> (i32, i32) {
    %c0_i32 = arith.constant 0 : i32
    %c0_i32_0 = arith.constant 0 : i32
    %c0_i32_1 = arith.constant 0 : i32
    return %c0_i32, %c0_i32_0 : i32, i32
  }
  func.func @transform_3(%arg0: i32, %arg1: i32) -> (i32, i32) {
    %c0_i32 = arith.constant 0 : i32
    %c0_i32_0 = arith.constant 0 : i32
    %c0_i32_1 = arith.constant 0 : i32
    return %c0_i32, %c0_i32_0 : i32, i32
  }
  func.func @transform_4(%arg0: i32, %arg1: i32) -> (i32, i32, i32) {
    %c0_i32 = arith.constant 0 : i32
    %c0_i32_0 = arith.constant 0 : i32
    return %arg0, %c0_i32, %arg1 : i32, i32, i32
  }
  func.func @transform_5(%arg0: i32, %arg1: i32) -> (i32, i32, i32) {
    %c0_i32 = arith.constant 0 : i32
    %c0_i32_0 = arith.constant 0 : i32
    return %arg0, %c0_i32, %arg1 : i32, i32, i32
  }
  func.func @transform_6(%arg0: i32, %arg1: i32) -> (i32, i32, i32) {
    %c0_i32 = arith.constant 0 : i32
    %c0_i32_0 = arith.constant 0 : i32
    return %arg0, %c0_i32, %arg1 : i32, i32, i32
  }
}

</mosaic_0001>

<bundles_post_ra>
// kernel: squeeze.2
= control target key start
LH: loop header
LB: loop body
LE: loop exit
PB: predicated region body
PF: predicated region fallthrough
CT: control target
= control target key end

     0   :  { %s149_s0 = inlined_call_operand.vmem [shape: s32[2,256], index: 0, kind: input, shape index: {}]   ;;  %s150_s1 = inlined_call_operand.hbm [shape: s32[2,1,16,16], index: 1, kind: output, shape index: {}]  }
   0x1   :  { %v71_v0 = vld [vmem:[%s149_s0 + $0x2] sm:$0x3]  ;;  %v9_v1 = vld [vmem:[%s149_s0] sm:$0x3] }
   0x2   :  { %8 = vst [vmem:[#allocation2 + $0x8] sm:$0x3] %v71_v0  ;;  %10 = vst [vmem:[#allocation2] sm:$0x3] %v9_v1 }
   0x3   :  { %2 = vsyncpa [#allocation1], 0  ;;  %vm12_vm0 = vcmask 130048   ;;  %s104_s0 = smov 112   ;;  %s105_s10 = smov 80  }
   0x4   :  { %s106_s11 = smov 96   ;;  %s107_s12 = smov 64  }
   0x5   :  { %s108_s13 = smov 48   ;;  %s109_s14 = smov 32  }
   0x6   :  { %s110_s15 = smov 16   ;;  %s111_s16 = smov [#allocation0]  }
   0x7   :  { %s65_s17 = sshll.u32 %s111_s16, 4  ;;  %s66_s17 = int_to_ptr.vmem [resolvable:$true] %s65_s17 }
   0x8   :  { %s80_s18 = scalar_lea.vmem %s66_s17, 512  ;;  %p85_p1 = scmp.lt.s32.totalorder %s66_s17, %s66_s17 }
   0x9   :  { %v19_v2 = vld.sshfl [vmem:[#allocation2] sm:$0xff pattern:$0x99999180]   ;;  %p81_p0 = scmp.ne.s32.totalorder %s66_s17, %s80_s18  ;;  %p86_p2 = scmp.lt.s32.totalorder %s80_s18, %s80_s18 }
   0xa   :  { %v11_v3 = vld [vmem:[#allocation2] sm:$0x3]   ;;  %20 = vrot.lane.b32.xlu0 %v19_v2, %s104_s0  ;;  %32 = vrot.lane.b32.xlu1 %v19_v2, %s105_s10  ;;  %v15_v4 = vld [vmem:[#allocation2 + $0x8] sm:$0x3]  }
   0xb   :  { %13 = vst.msk [vmem:[#allocation0] ss:$16 sm:$0x3] %vm12_vm0, %v11_v3   ;;  %18 = vst.msk [vmem:[#allocation0 + $0x8] ss:$16 sm:$0x3] %vm12_vm0, %v15_v4   ;;  %p87_p3 = por %p86_p2, %p85_p1 }
   0xd   :  { %p88_p4 = pnand %p87_p3, %p81_p0 }
   0xe   :  { %26 = vrot.lane.b32.xlu0 %v19_v2, %s106_s11  ;;  %38 = vrot.lane.b32.xlu1 %v19_v2, %s107_s12 }
  0x12   :  { %44 = vrot.lane.b32.xlu0 %v19_v2, %s108_s13  ;;  %50 = vrot.lane.b32.xlu1 %v19_v2, %s109_s14 }
  0x16   :  { %56 = vrot.lane.b32.xlu0 %v19_v2, %s110_s15 }
  0x7c   :  { %v21_v5 = vpop.permute.xlu0 %20   ;;  %v33_v6 = vpop.permute.xlu1 %32  }
  0x7d   :  { %24 = vst.msk [vmem:[#allocation0 + $0x1] ss:$8 sm:$0xf] %vm12_vm0, %v21_v5   ;;  %36 = vst.msk [vmem:[#allocation0 + $0x3] ss:$8 sm:$0xf] %vm12_vm0, %v33_v6  }
  0x80   :  { %v27_v7 = vpop.permute.xlu0 %26   ;;  %v39_v8 = vpop.permute.xlu1 %38  }
  0x81   :  { %30 = vst.msk [vmem:[#allocation0 + $0x2] ss:$8 sm:$0xf] %vm12_vm0, %v27_v7   ;;  %42 = vst.msk [vmem:[#allocation0 + $0x4] ss:$8 sm:$0xf] %vm12_vm0, %v39_v8  }
  0x84   :  { %v45_v9 = vpop.permute.xlu0 %44   ;;  %v51_v10 = vpop.permute.xlu1 %50  }
  0x85   :  { %48 = vst.msk [vmem:[#allocation0 + $0x5] ss:$8 sm:$0xf] %vm12_vm0, %v45_v9   ;;  %54 = vst.msk [vmem:[#allocation0 + $0x6] ss:$8 sm:$0xf] %vm12_vm0, %v51_v10  }
  0x88   :  { %v57_v11 = vpop.permute.xlu0 %56  }
  0x89   :  { %60 = vst.msk [vmem:[#allocation0 + $0x7] ss:$8 sm:$0xf] %vm12_vm0, %v57_v11  }
  0x8a   :  { %91 = shalt.err (!%p88_p4)
}
  0x8b   :  { %s92_s21 = scalar_lea.hbm %s150_s1, 512 }
  0x8c   :  { %p93_p5 = scmp.ne.s32.totalorder %s150_s1, %s92_s21  ;;  %p96_p6 = scmp.lt.u32.totalorder %s92_s21, %s150_s1 }
  0x8e   :  { %p98_p7 = pnand %p96_p6, %p93_p5 }
  0x90   :  { %101 = shalt.err (!%p98_p7)
}
  0x91   :  { %68 = dma.vmem_to_hbm [thread:$0]  %s66_s17, 512, %s150_s1, [#allocation1]  }
  0x92   :  { %102 = dma.done.wait [#allocation1], 512  }
  0x93   :  { %103 = vsyncadd [#allocation1], 4294966784 }
  0x94   :  { %70 = vsyncpa [#allocation1], 1 }

// kernel: vector_quantizer_forward.1
= control target key start
LH: loop header
LB: loop body
LE: loop exit
PB: predicated region body
PF: predicated region fallthrough
CT: control target
= control target key end

     0   :  { %s1570_s21 = smov 0   ;;  %s1572_s22 = smov 0   ;;  %s2249_s0 = inlined_call_operand.vmem [shape: f32[2,32,256], index: 0, kind: input, shape index: {}]   ;;  %s2250_s1 = inlined_call_operand.vmem [shape: f32[128,32], index: 1, kind: input, shape index: {}]   ;;  %s2251_s2 = inlined_call_operand.vmem [shape: f32[32,128], index: 2, kind: input, shape index: {}]   ;;  %s2252_s3 = inlined_call_operand.vmem [shape: f32[128,1], index: 3, kind: input, shape index: {}]   ;;  %s2253_s4 = inlined_call_operand.vmem [shape: f32[2,32,256], index: 4, kind: output, shape index: {0}]   ;;  %s2254_s5 = inlined_call_operand.vmem [shape: s32[2,1,256], index: 5, kind: output, shape index: {1}]   ;;  %s2255_s6 = inlined_call_operand.vmem [shape: f32[2,1,256], index: 6, kind: output, shape index: {2}]  }
   0x1   :  { %s1574_s23 = smov 0  }
   0x2 LB: > { %s29_s24 = sadd.s32 1, %s1525_s22  ;;  %p1346_p0 = scmp.ge.s32.totalorder %s1529_s23, 1  ;;  %s1529_s23 = sphi %s1574_s23, %s17_s23   ;;  %s1525_s22 = sphi %s1572_s22, %s2270_s22   ;;  %s1521_s21 = sphi %s1570_s21, %s2269_s21  }
   0x3   : > { %p31_p1 = scmp.ge.s32.totalorder %s29_s24, 2  ;;  %p242_p2 = scmp.lt.s32.totalorder %s1529_s23, 3 }
   0x5   : > { %s2272_s24 = smov (%p31_p1, %s29_s24), 0  ;;  %p243_p3 = pnand %p1346_p0, %p242_p2 }
   0x6   : > { %p297_p4 = scmp.lt.s32.totalorder (!%p243_p3), %s1521_s21, 1  ;;  %v2256_v0 = vmov (!%p243_p3), 0.0   ;;  %v1532_v1 = vmov (!%p243_p3), 0   ;;  %v572_v2 = vld [vmem:[%s2252_s3] sm:$0xff] (!%p243_p3)  ;;  %v573_v3 = vld [vmem:[%s2252_s3 + $0x8] sm:$0xff] (!%p243_p3)  ;;  %v574_v15 = vld [vmem:[%s2252_s3 + $0x10] sm:$0xff] (!%p243_p3) }
   0x7   : > { %246 = sbr.rel (%p243_p3) target bundleno = 650 (0x28a), region = 36  ;;  %475 = vmatprep.mubr.f32.mxu0 (!%p243_p3), %v2256_v0  ;;  %1061 = vmatprep.mubr.f32.mxu1 (!%p243_p3), %v2256_v0  ;;  %v575_v17 = vld [vmem:[%s2252_s3 + $0x18] sm:$0xff] (!%p243_p3)  ;;  %v576_v18 = vld [vmem:[%s2252_s3 + $0x20] sm:$0xff] (!%p243_p3)  ;;  %vm362_vm0 = vcmask (!%p243_p3), 261120   ;;  %v577_v20 = vld [vmem:[%s2252_s3 + $0x28] sm:$0xff] (!%p243_p3) }
   0x8   : > { %1505 = vset.pattern.permute.xlu0 (!%p243_p3), %v1532_v1  ;;  %1506 = vset.pattern.permute.xlu1 (!%p243_p3), %v1532_v1  ;;  %v342_v19 = vld [vmem:[%s2250_s1] sm:$0xff] (!%p243_p3)  ;;  %v578_v21 = vld [vmem:[%s2252_s3 + $0x30] sm:$0xff] (!%p243_p3)  ;;  %v343_v22 = vld [vmem:[%s2250_s1 + $0x8] sm:$0xff] (!%p243_p3) }
   0x9   : > { %590 = vperm.xlu0 (!%p243_p3), %1505, %v572_v2   ;;  %600 = vperm.xlu1 (!%p243_p3), %1506, %v574_v15   ;;  %v579_v23 = vld [vmem:[%s2252_s3 + $0x38] sm:$0xff] (!%p243_p3)  ;;  %v580_v24 = vld [vmem:[%s2252_s3 + $0x40] sm:$0xff] (!%p243_p3)  ;;  %v344_v25 = vld [vmem:[%s2250_s1 + $0x10] sm:$0xff] (!%p243_p3) }
   0xa   : > { %v581_v26 = vld [vmem:[%s2252_s3 + $0x48] sm:$0xff] (!%p243_p3)  ;;  %v582_v27 = vld [vmem:[%s2252_s3 + $0x50] sm:$0xff] (!%p243_p3)  ;;  %v345_v28 = vld [vmem:[%s2250_s1 + $0x18] sm:$0xff] (!%p243_p3) }
   0xb   : > { %v583_v29 = vld [vmem:[%s2252_s3 + $0x58] sm:$0xff] (!%p243_p3)  ;;  %v584_v30 = vld [vmem:[%s2252_s3 + $0x60] sm:$0xff] (!%p243_p3)  ;;  %v585_v32 = vld [vmem:[%s2252_s3 + $0x68] sm:$0xff] (!%p243_p3) }
   0xc   : > { %v346_v31 = vld [vmem:[%s2250_s1 + $0x20] sm:$0xff] (!%p243_p3)  ;;  %v586_v33 = vld [vmem:[%s2252_s3 + $0x70] sm:$0xff] (!%p243_p3)  ;;  %v347_v34 = vld [vmem:[%s2250_s1 + $0x28] sm:$0xff] (!%p243_p3) }
   0xd   : > { %595 = vperm.xlu0 (!%p243_p3), %1505, %v573_v3   ;;  %605 = vperm.xlu1 (!%p243_p3), %1506, %v575_v17   ;;  %v587_v35 = vld [vmem:[%s2252_s3 + $0x78] sm:$0xff] (!%p243_p3)  ;;  %v348_v36 = vld [vmem:[%s2250_s1 + $0x30] sm:$0xff] (!%p243_p3)  ;;  %v350_v38 = vld [vmem:[%s2250_s1 + $0x40] sm:$0xff] (!%p243_p3) }
   0xe   : > { %s2274_s21 = smov (!%p297_p4, %s1521_s21), 1  ;;  %v349_v37 = vld [vmem:[%s2250_s1 + $0x38] sm:$0xff]  ;;  %v351_v39 = vld [vmem:[%s2250_s1 + $0x48] sm:$0xff]  ;;  %v352_v40 = vld [vmem:[%s2250_s1 + $0x50] sm:$0xff] }
   0xf   : > { %s1435_s25 = sshll.u32 %s2274_s21, 6  ;;  %v353_v41 = vld [vmem:[%s2250_s1 + $0x58] sm:$0xff]  ;;  %v354_v42 = vld [vmem:[%s2250_s1 + $0x60] sm:$0xff]  ;;  %v355_v43 = vld [vmem:[%s2250_s1 + $0x68] sm:$0xff]  ;;  %s1351_s12 = sshll.u32 %s2274_s21, 1 }
  0x10   : > { %s304_s28 = scalar_lea.vmem %s2249_s0, %s1435_s25  ;;  %v356_v44 = vld [vmem:[%s2250_s1 + $0x70] sm:$0xff]  ;;  %v357_v45 = vld [vmem:[%s2250_s1 + $0x78] sm:$0xff]  ;;  %s323_s15 = scalar_lea.vmem %s2254_s5, %s1351_s12 }
  0x11   : > { %v1604_v4 = vld [vmem:[%s304_s28 + $0x8] sm:$0xff]  ;;  %v1606_v5 = vld [vmem:[%s304_s28 + $0x18] sm:$0xff]  ;;  %v1608_v6 = vld [vmem:[%s304_s28] sm:$0xff]  ;;  %610 = vperm.xlu0 %1505, %v576_v18   ;;  %615 = vperm.xlu1 %1506, %v577_v20   ;;  %s2213_s7 = scalar_lea.vmem %s2253_s4, %s1435_s25  ;;  %s332_s9 = scalar_lea.vmem %s2255_s6, %s1351_s12 }
  0x12   : > { %v1437_v7 = vpack.c.bf16 %v1606_v5, %v1604_v4  ;;  %v1612_v8 = vld [vmem:[%s304_s28 + $0x10] sm:$0xff]  ;;  %v1614_v9 = vld [vmem:[%s304_s28 + $0x28] sm:$0xff]  ;;  %v1616_v10 = vld [vmem:[%s304_s28 + $0x38] sm:$0xff] }
  0x13   : > { %v1439_v11 = vpack.c.bf16 %v1612_v8, %v1608_v6  ;;  %v1441_v12 = vpack.c.bf16 %v1616_v10, %v1614_v9  ;;  %v1622_v13 = vld [vmem:[%s304_s28 + $0x20] sm:$0xff]  ;;  %v1624_v14 = vld [vmem:[%s304_s28 + $0x30] sm:$0xff] }
  0x14   : > { %1438 = vmatprep.subr.bf16.mxu0 %v1437_v7  ;;  %v1443_v16 = vpack.c.bf16 %v1624_v14, %v1622_v13 }
  0x15   : > { %1440 = vmatpush1.bf16.msra.mxu0 %v1439_v11  ;;  %620 = vperm.xlu0 %1505, %v578_v21  }
  0x16   : > { %1442 = vmatprep.subr.bf16.mxu0 %v1441_v12  ;;  %625 = vperm.xlu1 %1506, %v579_v23  }
  0x19   : > { %1444 = vmatpush1.bf16.msra.mxu0 %v1443_v16  ;;  %630 = vperm.xlu0 %1505, %v580_v24  }
  0x1a   : > { %635 = vperm.xlu1 %1506, %v581_v26  }
  0x1c   : > { %1353 = vmatmul.mubr.msk.f32.vlgmr.msra.gmra.mrb[0].mxu0 %vm362_vm0, %v342_v19 }
  0x1d   : > { %481 = vmatprep.mubr.f32.mxu0 %v2256_v0  ;;  %640 = vperm.xlu0 %1505, %v582_v27  }
  0x1e   : > { %645 = vperm.xlu1 %1506, %v583_v29  }
  0x20   : > { %1354 = vmatmul.mubr.msk.f32.gmra.mrb[2].mxu0 %vm362_vm0, %v343_v22 }
  0x21   : > { %487 = vmatprep.mubr.f32.mxu0 %v2256_v0  ;;  %650 = vperm.xlu0 %1505, %v584_v30  }
  0x22   : > { %655 = vperm.xlu1 %1506, %v585_v32  }
  0x24   : > { %1355 = vmatmul.mubr.msk.f32.gmra.mrb[4].mxu0 %vm362_vm0, %v344_v25 }
  0x25   : > { %493 = vmatprep.mubr.f32.mxu0 %v2256_v0  ;;  %660 = vperm.xlu0 %1505, %v586_v33  }
  0x26   : > { %665 = vperm.xlu1 %1506, %v587_v35  }
  0x28   : > { %1356 = vmatmul.mubr.msk.f32.gmra.mrb[6].mxu0 %vm362_vm0, %v345_v28 }
  0x29   : > { %499 = vmatprep.mubr.f32.mxu0 %v2256_v0 }
  0x2c   : > { %1357 = vmatmul.mubr.msk.f32.gmra.mrb[8].mxu0 %vm362_vm0, %v346_v31 }
  0x2d   : > { %505 = vmatprep.mubr.f32.mxu0 %v2256_v0 }
  0x30   : > { %1358 = vmatmul.mubr.msk.f32.gmra.mrb[10].mxu0 %vm362_vm0, %v347_v34 }
  0x31   : > { %511 = vmatprep.mubr.f32.mxu0 %v2256_v0 }
  0x34   : > { %1359 = vmatmul.mubr.msk.f32.gmra.mrb[12].mxu0 %vm362_vm0, %v348_v36 }
  0x35   : > { %517 = vmatprep.mubr.f32.mxu0 %v2256_v0 }
  0x38   : > { %1360 = vmatmul.mubr.msk.f32.gmra.mrb[14].mxu0 %vm362_vm0, %v349_v37 }
  0x39   : > { %523 = vmatprep.mubr.f32.mxu0 %v2256_v0 }
  0x3c   : > { %1361 = vmatmul.mubr.msk.f32.gmra.mrb[16].mxu0 %vm362_vm0, %v350_v38 }
  0x3d   : > { %529 = vmatprep.mubr.f32.mxu0 %v2256_v0 }
  0x40   : > { %1362 = vmatmul.mubr.msk.f32.gmra.mrb[18].mxu0 %vm362_vm0, %v351_v39 }
  0x41   : > { %535 = vmatprep.mubr.f32.mxu0 %v2256_v0 }
  0x44   : > { %1363 = vmatmul.mubr.msk.f32.gmra.mrb[20].mxu0 %vm362_vm0, %v352_v40 }
  0x45   : > { %541 = vmatprep.mubr.f32.mxu0 %v2256_v0 }
  0x48   : > { %1364 = vmatmul.mubr.msk.f32.gmra.mrb[22].mxu0 %vm362_vm0, %v353_v41 }
  0x49   : > { %547 = vmatprep.mubr.f32.mxu0 %v2256_v0 }
  0x4c   : > { %1365 = vmatmul.mubr.msk.f32.gmra.mrb[24].mxu0 %vm362_vm0, %v354_v42 }
  0x4d   : > { %553 = vmatprep.mubr.f32.mxu0 %v2256_v0 }
  0x50   : > { %1366 = vmatmul.mubr.msk.f32.gmra.mrb[26].mxu0 %vm362_vm0, %v355_v43 }
  0x51   : > { %559 = vmatprep.mubr.f32.mxu0 %v2256_v0 }
  0x54   : > { %1367 = vmatmul.mubr.msk.f32.gmra.mrb[28].mxu0 %vm362_vm0, %v356_v44 }
  0x55   : > { %565 = vmatprep.mubr.f32.mxu0 %v2256_v0 }
  0x58   : > { %1368 = vmatmul.mubr.msk.f32.gmra.mrb[30].mxu0 %vm362_vm0, %v357_v45 }
  0x88   : > { %v591_v48 = vpop.permute.xlu0 %590  ;;  %v601_v51 = vpop.permute.xlu1 %600 }
  0x8c   : > { %v596_v57 = vpop.permute.xlu0 %595  ;;  %v606_v60 = vpop.permute.xlu1 %605 }
  0x90   : > { %v611_v12 = vpop.permute.xlu0 %610  ;;  %v616_v21 = vpop.permute.xlu1 %615 }
  0x94   : > { %v621_v28 = vpop.permute.xlu0 %620 }
  0x95   : > { %v626_v35 = vpop.permute.xlu1 %625 }
  0x98   : > { %v631_v42 = vpop.permute.xlu0 %630 }
  0xef   : > { %v477_v46 = vpop.f32.mrb[0].mxu0 }
  0xf0   : > { %v479_v47 = vpop.f32.mrb[1].mxu0  ;;  %v1749_v53 = vsub.f32 %v591_v48, %v477_v46 }
  0xf1   : > { %v1753_v56 = vsub.f32 %v591_v48, %v479_v47 }
  0xf3   : > { %v483_v49 = vpop.f32.mrb[2].mxu0 }
  0xf4   : > { %v485_v50 = vpop.f32.mrb[3].mxu0  ;;  %v1761_v63 = vsub.f32 %v596_v57, %v483_v49  ;;  %v636_v49 = vpop.permute.xlu1 %635 }
  0xf5   : > { %v1765_v3 = vsub.f32 %v596_v57, %v485_v50 }
  0xf7   : > { %v489_v52 = vpop.f32.mrb[4].mxu0 }
  0xf8   : > { %v1751_v54 = vsub.f32 %v601_v51, %v489_v52  ;;  %v491_v55 = vpop.f32.mrb[5].mxu0 }
  0xf9   : > { %v1755_v58 = vsub.f32 %v601_v51, %v491_v55 }
  0xfa   : > { %v717_v59 = vmin.f32 %v1749_v53, %v1751_v54 }
  0xfb   : > { %v738_v61 = vmin.f32 %v1753_v56, %v1755_v58  ;;  %v495_v62 = vpop.f32.mrb[6].mxu0 }
  0xfc   : > { %v1763_v1 = vsub.f32 %v606_v60, %v495_v62  ;;  %v497_v2 = vpop.f32.mrb[7].mxu0 }
  0xfd   : > { %v1767_v7 = vsub.f32 %v606_v60, %v497_v2  ;;  %v641_v60 = vpop.permute.xlu0 %640 }
  0xfe   : > { %v718_v11 = vmin.f32 %v1761_v63, %v1763_v1 }
  0xff   : > { %v739_v15 = vmin.f32 %v1765_v3, %v1767_v7  ;;  %v501_v16 = vpop.f32.mrb[8].mxu0 }
 0x100   : > { %v1773_v17 = vsub.f32 %v611_v12, %v501_v16  ;;  %v503_v18 = vpop.f32.mrb[9].mxu0  ;;  %v646_v16 = vpop.permute.xlu1 %645 }
 0x101   : > { %v1775_v19 = vsub.f32 %v611_v12, %v503_v18 }
 0x102   : > { %v719_v20 = vmin.f32 %v717_v59, %v1773_v17 }
 0x103   : > { %v740_v22 = vmin.f32 %v738_v61, %v1775_v19  ;;  %v507_v23 = vpop.f32.mrb[10].mxu0 }
 0x104   : > { %v1779_v24 = vsub.f32 %v616_v21, %v507_v23  ;;  %v509_v25 = vpop.f32.mrb[11].mxu0 }
 0x105   : > { %v1781_v26 = vsub.f32 %v616_v21, %v509_v25 }
 0x106   : > { %v720_v27 = vmin.f32 %v718_v11, %v1779_v24 }
 0x107   : > { %v741_v29 = vmin.f32 %v739_v15, %v1781_v26  ;;  %v513_v30 = vpop.f32.mrb[12].mxu0 }
 0x108   : > { %v1785_v31 = vsub.f32 %v621_v28, %v513_v30  ;;  %v515_v32 = vpop.f32.mrb[13].mxu0 }
 0x109   : > { %v1787_v33 = vsub.f32 %v621_v28, %v515_v32 }
 0x10a   : > { %v721_v34 = vmin.f32 %v719_v20, %v1785_v31 }
 0x10b   : > { %v742_v36 = vmin.f32 %v740_v22, %v1787_v33  ;;  %v519_v37 = vpop.f32.mrb[14].mxu0 }
 0x10c   : > { %v1791_v38 = vsub.f32 %v626_v35, %v519_v37  ;;  %v521_v39 = vpop.f32.mrb[15].mxu0 }
 0x10d   : > { %v1793_v40 = vsub.f32 %v626_v35, %v521_v39 }
 0x10e   : > { %v722_v41 = vmin.f32 %v720_v27, %v1791_v38  ;;  %v651_v27 = vpop.permute.xlu0 %650 }
 0x10f   : > { %v743_v43 = vmin.f32 %v741_v29, %v1793_v40  ;;  %v525_v44 = vpop.f32.mrb[16].mxu0 }
 0x110   : > { %v1797_v45 = vsub.f32 %v631_v42, %v525_v44  ;;  %v527_v46 = vpop.f32.mrb[17].mxu0 }
 0x111   : > { %v1799_v47 = vsub.f32 %v631_v42, %v527_v46 }
 0x112   : > { %v723_v48 = vmin.f32 %v721_v34, %v1797_v45  ;;  %v661_v46 = vpop.permute.xlu0 %660 }
 0x113   : > { %v744_v50 = vmin.f32 %v742_v36, %v1799_v47  ;;  %v531_v51 = vpop.f32.mrb[18].mxu0  ;;  %v656_v36 = vpop.permute.xlu1 %655 }
 0x114   : > { %v1803_v52 = vsub.f32 %v636_v49, %v531_v51  ;;  %v533_v55 = vpop.f32.mrb[19].mxu0 }
 0x115   : > { %v1805_v57 = vsub.f32 %v636_v49, %v533_v55 }
 0x116   : > { %v724_v59 = vmin.f32 %v722_v41, %v1803_v52 }
 0x117   : > { %v745_v61 = vmin.f32 %v743_v43, %v1805_v57  ;;  %v537_v62 = vpop.f32.mrb[20].mxu0 }
 0x118   : > { %v1809_v2 = vsub.f32 %v641_v60, %v537_v62  ;;  %v539_v11 = vpop.f32.mrb[21].mxu0 }
 0x119   : > { %v1811_v12 = vsub.f32 %v641_v60, %v539_v11  ;;  %v666_v60 = vpop.permute.xlu1 %665 }
 0x11a   : > { %v725_v15 = vmin.f32 %v723_v48, %v1809_v2 }
 0x11b   : > { %v746_v18 = vmin.f32 %v744_v50, %v1811_v12  ;;  %v543_v20 = vpop.f32.mrb[22].mxu0 }
 0x11c   : > { %v1815_v21 = vsub.f32 %v646_v16, %v543_v20  ;;  %v545_v22 = vpop.f32.mrb[23].mxu0 }
 0x11d   : > { %v1817_v23 = vsub.f32 %v646_v16, %v545_v22 }
 0x11e   : > { %v726_v25 = vmin.f32 %v724_v59, %v1815_v21 }
 0x11f   : > { %v747_v28 = vmin.f32 %v745_v61, %v1817_v23  ;;  %v549_v29 = vpop.f32.mrb[24].mxu0 }
 0x120   : > { %v1821_v30 = vsub.f32 %v651_v27, %v549_v29  ;;  %v551_v32 = vpop.f32.mrb[25].mxu0 }
 0x121   : > { %v1823_v34 = vsub.f32 %v651_v27, %v551_v32  ;;  %v700_v27 = vlaneseq }
 0x122   : > { %v727_v35 = vmin.f32 %v725_v15, %v1821_v30 }
 0x123   : > { %v748_v37 = vmin.f32 %v746_v18, %v1823_v34  ;;  %v555_v39 = vpop.f32.mrb[26].mxu0 }
 0x124   : > { %v1827_v41 = vsub.f32 %v656_v36, %v555_v39  ;;  %v557_v42 = vpop.f32.mrb[27].mxu0 }
 0x125   : > { %v1829_v43 = vsub.f32 %v656_v36, %v557_v42  ;;  %v1846_v36 = vshrl.u32 %v700_v27, 7 }
 0x126   : > { %v728_v44 = vmin.f32 %v726_v25, %v1827_v41 }
 0x127   : > { %v749_v48 = vmin.f32 %v747_v28, %v1829_v43  ;;  %v561_v49 = vpop.f32.mrb[28].mxu0 }
 0x128   : > { %v1833_v50 = vsub.f32 %v661_v46, %v561_v49  ;;  %v563_v51 = vpop.f32.mrb[29].mxu0  ;;  %v1849_v49 = vadd.s32 8, %v1846_v36 }
 0x129   : > { %v1835_v55 = vsub.f32 %v661_v46, %v563_v51  ;;  %v1855_v51 = vadd.s32 24, %v1846_v36 }
 0x12a   : > { %v729_v59 = vmin.f32 %v727_v35, %v1833_v50 }
 0x12b   : > { %v750_v61 = vmin.f32 %v748_v37, %v1835_v55  ;;  %v567_v62 = vpop.f32.mrb[30].mxu0 }
 0x12c   : > { %v1839_v11 = vsub.f32 %v666_v60, %v567_v62  ;;  %v569_v15 = vpop.f32.mrb[31].mxu0  ;;  %v1867_v62 = vadd.s32 56, %v1846_v36 }
 0x12d   : > { %v1841_v16 = vsub.f32 %v666_v60, %v569_v15  ;;  %v1861_v60 = vadd.s32 40, %v1846_v36  ;;  %v1870_v15 = vadd.s32 64, %v1846_v36 }
 0x12e   : > { %v730_v18 = vmin.f32 %v728_v44, %v1839_v11  ;;  %v1852_v44 = vadd.s32 16, %v1846_v36 }
 0x12f   : > { %v751_v20 = vmin.f32 %v749_v48, %v1841_v16 }
 0x130   : > { %v731_v22 = vmin.f32 %v729_v59, %v730_v18  ;;  %v1858_v59 = vadd.s32 32, %v1846_v36  ;;  %v1873_v18 = vadd.s32 72, %v1846_v36 }
 0x131   : > { %v752_v25 = vmin.f32 %v750_v61, %v751_v20  ;;  %v1864_v61 = vadd.s32 48, %v1846_v36 }
 0x132   : > { %v732_v28 = vrot.slane %v731_v22, 4 }
 0x133   : > { %v753_v29 = vrot.slane %v752_v25, 4 }
 0x134   : > { %v733_v32 = vmin.f32 %v731_v22, %v732_v28  ;;  %v1878_v22 = vadd.s32 80, %v1846_v36  ;;  %v1884_v28 = vadd.s32 96, %v1846_v36 }
 0x135   : > { %v754_v35 = vmin.f32 %v752_v25, %v753_v29  ;;  %v1881_v25 = vadd.s32 88, %v1846_v36 }
 0x136   : > { %v734_v37 = vrot.slane %v733_v32, 2 }
 0x137   : > { %v755_v39 = vrot.slane %v754_v35, 2 }
 0x138   : > { %v735_v42 = vmin.f32 %v733_v32, %v734_v37  ;;  %v1919_v32 = vadd.s32 104, %v1846_v36  ;;  %v1925_v37 = vadd.s32 120, %v1846_v36 }
 0x139   : > { %v756_v46 = vmin.f32 %v754_v35, %v755_v39  ;;  %v1922_v35 = vadd.s32 112, %v1846_v36 }
 0x13a   : > { %v736_v48 = vrot.slane %v735_v42, 1 }
 0x13b   : > { %v757_v29 = vrot.slane %v756_v46, 1 }
 0x13c   : > { %v1875_v20 = vmin.f32 %v735_v42, %v736_v48 }
 0x13d   : > { %v1927_v39 = vmin.f32 %v756_v46, %v757_v29 }
 0x13e   : > { %vm759_vm1 = vcmp.eq.f32.partialorder %v1749_v53, %v1875_v20  ;;  %vm761_vm2 = vcmp.eq.f32.partialorder %v1761_v63, %v1875_v20  ;;  %vm763_vm3 = vcmp.eq.f32.partialorder %v1751_v54, %v1875_v20  ;;  %vm765_vm4 = vcmp.eq.f32.partialorder %v1763_v1, %v1875_v20 }
 0x13f   : > { %vm767_vm5 = vcmp.eq.f32.partialorder %v1773_v17, %v1875_v20  ;;  %vm769_vm6 = vcmp.eq.f32.partialorder %v1779_v24, %v1875_v20  ;;  %vm771_vm7 = vcmp.eq.f32.partialorder %v1785_v31, %v1875_v20  ;;  %vm773_vm8 = vcmp.eq.f32.partialorder %v1791_v38, %v1875_v20 }
 0x140   : > { %vm775_vm9 = vcmp.eq.f32.partialorder %v1797_v45, %v1875_v20  ;;  %vm777_vm10 = vcmp.eq.f32.partialorder %v1803_v52, %v1875_v20  ;;  %vm779_vm11 = vcmp.eq.f32.partialorder %v1809_v2, %v1875_v20  ;;  %vm781_vm12 = vcmp.eq.f32.partialorder %v1815_v21, %v1875_v20 }
 0x141   : > { %vm783_vm13 = vcmp.eq.f32.partialorder %v1821_v30, %v1875_v20  ;;  %vm785_vm14 = vcmp.eq.f32.partialorder %v1827_v41, %v1875_v20  ;;  %vm787_vm15 = vcmp.eq.f32.partialorder %v1833_v50, %v1875_v20  ;;  %vm789_vm0 = vcmp.eq.f32.partialorder %v1839_v11, %v1875_v20 }
 0x142   : > { %v791_v42 = vsel %vm759_vm1, %v1846_v36, 128  ;;  %v793_v48 = vsel %vm761_vm2, %v1849_v49, 128  ;;  %v795_v0 = vsel %vm763_vm3, %v1852_v44, 128  ;;  %v797_v46 = vsel %vm765_vm4, %v1855_v51, 128 }
 0x143   : > { %v799_v53 = vsel %vm767_vm5, %v1858_v59, 128  ;;  %v801_v63 = vsel %vm769_vm6, %v1861_v60, 128  ;;  %v803_v54 = vsel %vm771_vm7, %v1864_v61, 128  ;;  %v805_v1 = vsel %vm773_vm8, %v1867_v62, 128 }
 0x144   : > { %v807_v17 = vsel %vm775_vm9, %v1870_v15, 128  ;;  %v809_v24 = vsel %vm777_vm10, %v1873_v18, 128  ;;  %v811_v31 = vsel %vm779_vm11, %v1878_v22, 128  ;;  %v813_v38 = vsel %vm781_vm12, %v1881_v25, 128 }
 0x145   : > { %vm823_vm1 = vcmp.lt.s32.totalorder %v791_v42, %v795_v0  ;;  %vm825_vm2 = vcmp.lt.s32.totalorder %v793_v48, %v797_v46  ;;  %vm760_vm3 = vcmp.eq.f32.partialorder %v1753_v56, %v1927_v39  ;;  %vm762_vm4 = vcmp.eq.f32.partialorder %v1765_v3, %v1927_v39 }
 0x146   : > { %v824_v45 = vsel %vm823_vm1, %v791_v42, %v795_v0  ;;  %v826_v52 = vsel %vm825_vm2, %v793_v48, %v797_v46  ;;  %vm776_vm6 = vcmp.eq.f32.partialorder %v1799_v47, %v1927_v39  ;;  %vm784_vm12 = vcmp.eq.f32.partialorder %v1823_v34, %v1927_v39 }
 0x147   : > { %vm827_vm7 = vcmp.lt.s32.totalorder %v824_v45, %v799_v53  ;;  %vm829_vm8 = vcmp.lt.s32.totalorder %v826_v52, %v801_v63  ;;  %vm786_vm9 = vcmp.eq.f32.partialorder %v1829_v43, %v1927_v39  ;;  %v815_v46 = vsel %vm783_vm13, %v1884_v28, 128 }
 0x148   : > { %v828_v2 = vsel %vm827_vm7, %v824_v45, %v799_v53  ;;  %v830_v21 = vsel %vm829_vm8, %v826_v52, %v801_v63  ;;  %vm782_vm8 = vcmp.eq.f32.partialorder %v1817_v23, %v1927_v39  ;;  %v817_v53 = vsel %vm785_vm14, %v1919_v32, 128 }
 0x149   : > { %vm831_vm1 = vcmp.lt.s32.totalorder %v828_v2, %v803_v54  ;;  %vm833_vm2 = vcmp.lt.s32.totalorder %v830_v21, %v805_v1  ;;  %v792_v41 = vsel %vm760_vm3, %v1846_v36, 128  ;;  %v794_v50 = vsel %vm762_vm4, %v1849_v49, 128 }
 0x14a   : > { %v832_v0 = vsel %vm831_vm1, %v828_v2, %v803_v54  ;;  %v834_v29 = vsel %vm833_vm2, %v830_v21, %v805_v1  ;;  %vm788_vm1 = vcmp.eq.f32.partialorder %v1835_v55, %v1927_v39  ;;  %vm790_vm2 = vcmp.eq.f32.partialorder %v1841_v16, %v1927_v39 }
 0x14b   : > { %vm835_vm11 = vcmp.lt.s32.totalorder %v832_v0, %v807_v17  ;;  %vm837_vm10 = vcmp.lt.s32.totalorder %v834_v29, %v809_v24  ;;  %v819_v1 = vsel %vm787_vm15, %v1922_v35, 128  ;;  %vm2258_vm15 = vcmp.eq.f32.partialorder %v1755_v58, %v1927_v39 }
 0x14c   : > { %v836_v42 = vsel %vm835_vm11, %v832_v0, %v807_v17  ;;  %v838_v48 = vsel %vm837_vm10, %v834_v29, %v809_v24  ;;  %v821_v17 = vsel %vm789_vm0, %v1925_v37, 128  ;;  %v796_v11 = vsel %vm2258_vm15, %v1852_v44, 128 }
 0x14d   : > { %vm839_vm7 = vcmp.lt.s32.totalorder %v836_v42, %v811_v31  ;;  %vm841_vm5 = vcmp.lt.s32.totalorder %v838_v48, %v813_v38  ;;  %vm2259_vm0 = vcmp.eq.f32.partialorder %v1767_v7, %v1927_v39  ;;  %vm2260_vm4 = vcmp.eq.f32.partialorder %v1775_v19, %v1927_v39 }
 0x14e   : > { %v840_v63 = vsel %vm839_vm7, %v836_v42, %v811_v31  ;;  %v842_v54 = vsel %vm841_vm5, %v838_v48, %v813_v38  ;;  %v798_v20 = vsel %vm2259_vm0, %v1855_v51, 128  ;;  %v800_v3 = vsel %vm2260_vm4, %v1858_v59, 128 }
 0x14f   : > { %vm843_vm10 = vcmp.lt.s32.totalorder %v840_v63, %v815_v46  ;;  %vm845_vm11 = vcmp.lt.s32.totalorder %v842_v54, %v817_v53  ;;  %vm862_vm5 = vcmp.lt.s32.totalorder %v792_v41, %v796_v11  ;;  %vm864_vm7 = vcmp.lt.s32.totalorder %v794_v50, %v798_v20 }
 0x150   : > { %v844_v30 = vsel %vm843_vm10, %v840_v63, %v815_v46  ;;  %v846_v24 = vsel %vm845_vm11, %v842_v54, %v817_v53  ;;  %vm2261_vm10 = vcmp.eq.f32.partialorder %v1781_v26, %v1927_v39  ;;  %v863_v52 = vsel %vm862_vm5, %v792_v41, %v796_v11 }
 0x151   : > { %vm847_vm13 = vcmp.lt.s32.totalorder %v844_v30, %v819_v1  ;;  %vm849_vm14 = vcmp.lt.s32.totalorder %v846_v24, %v821_v17  ;;  %v802_v58 = vsel %vm2261_vm10, %v1861_v60, 128  ;;  %v865_v7 = vsel %vm864_vm7, %v794_v50, %v798_v20 }
 0x152   : > { %v848_v31 = vsel %vm847_vm13, %v844_v30, %v819_v1  ;;  %v850_v56 = vsel %vm849_vm14, %v846_v24, %v821_v17  ;;  %vm2262_vm11 = vcmp.eq.f32.partialorder %v1787_v33, %v1927_v39  ;;  %vm866_vm13 = vcmp.lt.s32.totalorder %v863_v52, %v800_v3 }
 0x153   : > { %vm851_vm3 = vcmp.lt.s32.totalorder %v848_v31, %v850_v56  ;;  %v804_v2 = vsel %vm2262_vm11, %v1864_v61, 128  ;;  %vm868_vm14 = vcmp.lt.s32.totalorder %v865_v7, %v802_v58  ;;  %vm2263_vm0 = vcmp.eq.f32.partialorder %v1793_v40, %v1927_v39 }
 0x154   : > { %v852_v38 = vsel %vm851_vm3, %v848_v31, %v850_v56  ;;  %v806_v19 = vsel %vm2263_vm0, %v1867_v62, 128  ;;  %v867_v21 = vsel %vm866_vm13, %v863_v52, %v800_v3  ;;  %v869_v0 = vsel %vm868_vm14, %v865_v7, %v802_v58 }
 0x155   : > { %v853_v45 = vrot.slane %v852_v38, 4  ;;  %vm870_vm3 = vcmp.lt.s32.totalorder %v867_v21, %v804_v2  ;;  %vm872_vm4 = vcmp.lt.s32.totalorder %v869_v0, %v806_v19  ;;  %v808_v26 = vsel %vm776_vm6, %v1870_v15, 128 }
 0x156   : > { %vm2264_vm5 = vcmp.eq.f32.partialorder %v1805_v57, %v1927_v39  ;;  %v871_v42 = vsel %vm870_vm3, %v867_v21, %v804_v2  ;;  %v873_v48 = vsel %vm872_vm4, %v869_v0, %v806_v19  ;;  %vm2265_vm7 = vcmp.eq.f32.partialorder %v1811_v12, %v1927_v39 }
 0x157   : > { %vm854_vm15 = vcmp.lt.s32.totalorder %v852_v38, %v853_v45  ;;  %v810_v33 = vsel %vm2264_vm5, %v1873_v18, 128  ;;  %v812_v40 = vsel %vm2265_vm7, %v1878_v22, 128  ;;  %vm874_vm10 = vcmp.lt.s32.totalorder %v871_v42, %v808_v26 }
 0x158   : > { %v855_v29 = vsel %vm854_vm15, %v852_v38, %v853_v45  ;;  %vm876_vm11 = vcmp.lt.s32.totalorder %v873_v48, %v810_v33  ;;  %v814_v47 = vsel %vm782_vm8, %v1881_v25, 128  ;;  %v875_v53 = vsel %vm874_vm10, %v871_v42, %v808_v26 }
 0x159   : > { %v856_v46 = vrot.slane %v855_v29, 2  ;;  %v877_v63 = vsel %vm876_vm11, %v873_v48, %v810_v33  ;;  %vm878_vm6 = vcmp.lt.s32.totalorder %v875_v53, %v812_v40  ;;  %v816_v57 = vsel %vm784_vm12, %v1884_v28, 128 }
 0x15a   : > { %vm880_vm13 = vcmp.lt.s32.totalorder %v877_v63, %v814_v47  ;;  %v818_v12 = vsel %vm786_vm9, %v1919_v32, 128  ;;  %v879_v54 = vsel %vm878_vm6, %v875_v53, %v812_v40  ;;  %v820_v23 = vsel %vm788_vm1, %v1922_v35, 128 }
 0x15b   : > { %v881_v1 = vsel %vm880_vm13, %v877_v63, %v814_v47  ;;  %vm882_vm8 = vcmp.lt.s32.totalorder %v879_v54, %v816_v57  ;;  %vm857_vm15 = vcmp.lt.s32.totalorder %v855_v29, %v856_v46  ;;  %v822_v34 = vsel %vm790_vm2, %v1925_v37, 128 }
 0x15c   : > { %vm884_vm14 = vcmp.lt.s32.totalorder %v881_v1, %v818_v12  ;;  %v883_v17 = vsel %vm882_vm8, %v879_v54, %v816_v57  ;;  %v858_v41 = vsel %vm857_vm15, %v855_v29, %v856_v46  ;;  %v1533_v56 = vmov 1966171168  }
 0x15d   : > { %v885_v30 = vsel %vm884_vm14, %v881_v1, %v818_v12  ;;  %vm886_vm12 = vcmp.lt.s32.totalorder %v883_v17, %v820_v23  ;;  %v859_v55 = vrot.slane %v858_v41, 1  ;;  %v1096_v38 = vunpack.c.l.s4 %v1533_v56 }
 0x15e   : > { %vm888_vm0 = vcmp.lt.s32.totalorder %v885_v30, %v822_v34  ;;  %v887_v43 = vsel %vm886_vm12, %v883_v17, %v820_v23  ;;  %v1534_v52 = vmov 1.0|1.0  }
 0x15f   : > { %v889_v24 = vsel %vm888_vm0, %v885_v30, %v822_v34  ;;  %vm860_vm3 = vcmp.lt.s32.totalorder %v858_v41, %v859_v55  ;;  %v1097_v45 = vunpack.c.0.s8 %v1096_v38 }
 0x160   : > { %vm890_vm9 = vcmp.lt.s32.totalorder %v887_v43, %v889_v24  ;;  %v2089_v39 = vsel %vm860_vm3, %v858_v41, %v859_v55 }
 0x161   : > { %v891_v50 = vsel %vm890_vm9, %v887_v43, %v889_v24  ;;  %vm901_vm5 = vcmp.eq.s32.totalorder %v1846_v36, %v2089_v39  ;;  %vm903_vm7 = vcmp.eq.s32.totalorder %v1849_v49, %v2089_v39  ;;  %v2107_v7 = vsub.s32 %v1097_v45, %v1846_v36 }
 0x162   : > { %v892_v11 = vrot.slane %v891_v50, 4  ;;  %vm1447_vm14 = vmpackc.low %vm903_vm7, %vm901_vm5  ;;  %vm905_vm12 = vcmp.eq.s32.totalorder %v1852_v44, %v2089_v39  ;;  %vm907_vm0 = vcmp.eq.s32.totalorder %v1855_v51, %v2089_v39  ;;  %vm911_vm5 = vcmp.eq.s32.totalorder %v1861_v60, %v2089_v39 }
 0x163   : > { %vm1451_vm3 = vmpackc.low %vm907_vm0, %vm905_vm12  ;;  %vm2134_vm7 = vcmp.lt.s32.totalorder %v700_v27, 256  ;;  %v358_v27 = vld [vmem:[%s2251_s2] sm:$0xff] }
 0x164   : > { %vm893_vm1 = vcmp.lt.s32.totalorder %v891_v50, %v892_v11 }
 0x165   : > { %v894_v20 = vsel %vm893_vm1, %v891_v50, %v892_v11 }
 0x166   : > { %v895_v31 = vrot.slane %v894_v20, 2 }
 0x168   : > { %vm896_vm4 = vcmp.lt.s32.totalorder %v894_v20, %v895_v31 }
 0x169   : > { %v897_v16 = vsel %vm896_vm4, %v894_v20, %v895_v31 }
 0x16a   : > { %v898_v3 = vrot.slane %v897_v16, 1 }
 0x16c   : > { %vm899_vm2 = vcmp.lt.s32.totalorder %v897_v16, %v898_v3 }
 0x16d   : > { %v2091_v58 = vsel %vm899_vm2, %v897_v16, %v898_v3  ;;  %vm909_vm2 = vcmp.eq.s32.totalorder %v1858_v59, %v2089_v39 }
 0x16e   : > { %vm902_vm10 = vcmp.eq.s32.totalorder %v1846_v36, %v2091_v58  ;;  %vm904_vm11 = vcmp.eq.s32.totalorder %v1849_v49, %v2091_v58  ;;  %vm906_vm6 = vcmp.eq.s32.totalorder %v1852_v44, %v2091_v58  ;;  %vm908_vm13 = vcmp.eq.s32.totalorder %v1855_v51, %v2091_v58 }
 0x16f   : > { %vm1445_vm8 = vmpackc.low %vm904_vm11, %vm902_vm10  ;;  %vm910_vm9 = vcmp.eq.s32.totalorder %v1858_v59, %v2091_v58  ;;  %vm912_vm1 = vcmp.eq.s32.totalorder %v1861_v60, %v2091_v58  ;;  %v1094_v36 = vcombine.low %v2089_v39, %v2091_v58  ;;  %vm914_vm10 = vcmp.eq.s32.totalorder %v1864_v61, %v2091_v58  ;;  %v359_v60 = vld [vmem:[%s2251_s2 + $0x8] sm:$0xff] }
 0x170   : > { %1446 = vmatprep.subr.msk.bf16.mxu1 %vm1445_vm8, %v1534_v52  ;;  %vm1449_vm15 = vmpackc.low %vm908_vm13, %vm906_vm6  ;;  %vm916_vm11 = vcmp.eq.s32.totalorder %v1867_v62, %v2091_v58  ;;  %vm913_vm8 = vcmp.eq.s32.totalorder %v1864_v61, %v2089_v39  ;;  %vm920_vm12 = vcmp.eq.s32.totalorder %v1873_v18, %v2091_v58  ;;  %v2268_v59 = vmov 0.0   ;;  %v360_v61 = vld [vmem:[%s2251_s2 + $0x10] sm:$0xff] }
 0x171   : > { %1448 = vmatpush1.bf16.msk.msra.mxu1 %vm1447_vm14, %v1534_v52  ;;  %v1101_v49 = vrot.slane %v1094_v36, %v2107_v7  ;;  %vm1453_vm4 = vmpackc.low %vm912_vm1, %vm910_vm9  ;;  %vm915_vm14 = vcmp.eq.s32.totalorder %v1867_v62, %v2089_v39  ;;  %vm917_vm1 = vcmp.eq.s32.totalorder %v1870_v15, %v2089_v39  ;;  %v361_v62 = vld [vmem:[%s2251_s2 + $0x18] sm:$0xff] }
 0x172   : > { %1450 = vmatprep.subr.msk.bf16.mxu1 %vm1449_vm15, %v1534_v52  ;;  %vm1455_vm6 = vmpackc.low %vm911_vm5, %vm909_vm2  ;;  %vm918_vm15 = vcmp.eq.s32.totalorder %v1870_v15, %v2091_v58  ;;  %vm924_vm2 = vcmp.eq.s32.totalorder %v1881_v25, %v2091_v58 }
 0x173   : > { %v1108_v51 = vrot.slane %v1101_v49, %v2107_v7  ;;  %vm1457_vm13 = vmpackc.low %vm916_vm11, %vm914_vm10  ;;  %vm921_vm11 = vcmp.eq.s32.totalorder %v1878_v22, %v2089_v39 }
 0x174   : > { %vm1459_vm0 = vmpackc.low %vm915_vm14, %vm913_vm8  ;;  %vm928_vm8 = vcmp.eq.s32.totalorder %v1919_v32, %v2091_v58 }
 0x175   : > { %1452 = vmatpush1.bf16.msk.msra.mxu1 %vm1451_vm3, %v1534_v52  ;;  %1113 = vst.msk [vmem:[%s323_s15] sm:$0x3] %vm2134_vm7, %v1108_v51  ;;  %vm1461_vm9 = vmpackc.low %vm920_vm12, %vm918_vm15  ;;  %vm919_vm3 = vcmp.eq.s32.totalorder %v1873_v18, %v2089_v39  ;;  %vm925_vm12 = vcmp.eq.s32.totalorder %v1884_v28, %v2089_v39 }
 0x176   : > { %1454 = vmatprep.subr.msk.bf16.mxu1 %vm1453_vm4, %v1534_v52  ;;  %vm922_vm4 = vcmp.eq.s32.totalorder %v1878_v22, %v2091_v58  ;;  %vm1463_vm5 = vmpackc.low %vm919_vm3, %vm917_vm1  ;;  %vm932_vm1 = vcmp.eq.s32.totalorder %v1925_v37, %v2091_v58 }
 0x177   : > { %vm1465_vm10 = vmpackc.low %vm924_vm2, %vm922_vm4  ;;  %vm929_vm2 = vcmp.eq.s32.totalorder %v1922_v35, %v2089_v39 }
 0x179   : > { %1456 = vmatpush1.bf16.msk.msra.mxu1 %vm1455_vm6, %v1534_v52  ;;  %vm923_vm6 = vcmp.eq.s32.totalorder %v1881_v25, %v2089_v39 }
 0x17a   : > { %1458 = vmatprep.subr.msk.bf16.mxu1 %vm1457_vm13, %v1534_v52  ;;  %vm926_vm13 = vcmp.eq.s32.totalorder %v1884_v28, %v2091_v58  ;;  %vm1467_vm14 = vmpackc.low %vm923_vm6, %vm921_vm11 }
 0x17b   : > { %vm1469_vm15 = vmpackc.low %vm928_vm8, %vm926_vm13 }
 0x17d   : > { %1460 = vmatpush1.bf16.msk.msra.mxu1 %vm1459_vm0, %v1534_v52  ;;  %vm927_vm0 = vcmp.eq.s32.totalorder %v1919_v32, %v2089_v39 }
 0x17e   : > { %1462 = vmatprep.subr.msk.bf16.mxu1 %vm1461_vm9, %v1534_v52  ;;  %vm930_vm9 = vcmp.eq.s32.totalorder %v1922_v35, %v2091_v58  ;;  %vm1471_vm3 = vmpackc.low %vm927_vm0, %vm925_vm12 }
 0x17f   : > { %vm1473_vm4 = vmpackc.low %vm932_vm1, %vm930_vm9 }
 0x181   : > { %1464 = vmatpush1.bf16.msk.msra.mxu1 %vm1463_vm5, %v1534_v52  ;;  %vm931_vm5 = vcmp.eq.s32.totalorder %v1925_v37, %v2089_v39 }
 0x182   : > { %1466 = vmatprep.subr.msk.bf16.mxu1 %vm1465_vm10, %v1534_v52  ;;  %vm1475_vm10 = vmpackc.low %vm931_vm5, %vm929_vm2 }
 0x185   : > { %1468 = vmatpush1.bf16.msk.msra.mxu1 %vm1467_vm14, %v1534_v52 }
 0x186   : > { %1470 = vmatprep.subr.msk.bf16.mxu1 %vm1469_vm15, %v1534_v52 }
 0x189   : > { %1472 = vmatpush1.bf16.msk.msra.mxu1 %vm1471_vm3, %v1534_v52 }
 0x18a   : > { %1474 = vmatprep.subr.msk.bf16.mxu1 %vm1473_vm4, %v1534_v52 }
 0x18d   : > { %1476 = vmatpush1.bf16.msk.msra.mxu1 %vm1475_vm10, %v1534_v52 }
 0x190   : > { %1062 = vmatmul.mubr.f32.vlgmr.msra.gmra.mrb[0].mxu1 %v358_v27 }
 0x191   : > { %1067 = vmatprep.mubr.f32.mxu1 %v2268_v59 }
 0x194   : > { %1068 = vmatmul.mubr.f32.gmra.mrb[2].mxu1 %v359_v60 }
 0x195   : > { %1073 = vmatprep.mubr.f32.mxu1 %v2268_v59 }
 0x198   : > { %1074 = vmatmul.mubr.f32.gmra.mrb[4].mxu1 %v360_v61 }
 0x199   : > { %1079 = vmatprep.mubr.f32.mxu1 %v2268_v59 }
 0x19c   : > { %1080 = vmatmul.mubr.f32.gmra.mrb[6].mxu1 %v361_v62 }
 0x263   : > { %v1063_v15 = vpop.f32.mrb[0].mxu1 }
 0x264   : > { %1086 = vst [vmem:[%s2213_s7] sm:$0xff] %v1063_v15  ;;  %v1065_v18 = vpop.f32.mrb[1].mxu1  ;;  %v1114_v22 = vsub.f32 %v1063_v15, %v1608_v6 }
 0x265   : > { %1087 = vst [vmem:[%s2213_s7 + $0x8] sm:$0xff] %v1065_v18  ;;  %v1115_v25 = vsub.f32 %v1065_v18, %v1604_v4 }
 0x266   : > { %v1122_v2 = vmul.f32 %v1114_v22, %v1114_v22 }
 0x267   : > { %v1069_v28 = vpop.f32.mrb[2].mxu1  ;;  %v1123_v21 = vmul.f32 %v1115_v25, %v1115_v25 }
 0x268   : > { %1088 = vst [vmem:[%s2213_s7 + $0x10] sm:$0xff] %v1069_v28  ;;  %v1116_v32 = vsub.f32 %v1069_v28, %v1612_v8  ;;  %v1071_v35 = vpop.f32.mrb[3].mxu1 }
 0x269   : > { %1089 = vst [vmem:[%s2213_s7 + $0x18] sm:$0xff] %v1071_v35  ;;  %v1117_v37 = vsub.f32 %v1071_v35, %v1606_v5 }
 0x26a   : > { %v1124_v19 = vmul.f32 %v1116_v32, %v1116_v32 }
 0x26b   : > { %v1125_v0 = vmul.f32 %v1117_v37, %v1117_v37  ;;  %v1075_v29 = vpop.f32.mrb[4].mxu1 }
 0x26c   : > { %v1130_v26 = vadd.f32 %v1124_v19, %v1122_v2  ;;  %1090 = vst [vmem:[%s2213_s7 + $0x20] sm:$0xff] %v1075_v29  ;;  %v1118_v4 = vsub.f32 %v1075_v29, %v1622_v13  ;;  %v1077_v6 = vpop.f32.mrb[5].mxu1 }
 0x26d   : > { %v1139_v33 = vadd.f32 %v1125_v0, %v1123_v21  ;;  %1091 = vst [vmem:[%s2213_s7 + $0x28] sm:$0xff] %v1077_v6  ;;  %v1119_v8 = vsub.f32 %v1077_v6, %v1614_v9 }
 0x26e   : > { %v1126_v42 = vmul.f32 %v1118_v4, %v1118_v4 }
 0x26f   : > { %v1127_v48 = vmul.f32 %v1119_v8, %v1119_v8  ;;  %v1081_v40 = vpop.f32.mrb[6].mxu1 }
 0x270   : > { %v1131_v5 = vadd.f32 %v1130_v26, %v1126_v42  ;;  %1092 = vst [vmem:[%s2213_s7 + $0x30] sm:$0xff] %v1081_v40  ;;  %v1120_v46 = vsub.f32 %v1081_v40, %v1624_v14  ;;  %v1083_v47 = vpop.f32.mrb[7].mxu1 }
 0x271   : > { %v1140_v53 = vadd.f32 %v1139_v33, %v1127_v48  ;;  %1093 = vst [vmem:[%s2213_s7 + $0x38] sm:$0xff] %v1083_v47  ;;  %v1121_v63 = vsub.f32 %v1083_v47, %v1616_v10 }
 0x272   : > { %v1128_v57 = vmul.f32 %v1120_v46, %v1120_v46 }
 0x273   : > { %v1129_v12 = vmul.f32 %v1121_v63, %v1121_v63 }
 0x274   : > { %v1132_v13 = vadd.f32 %v1131_v5, %v1128_v57 }
 0x275   : > { %v1141_v54 = vadd.f32 %v1140_v53, %v1129_v12 }
 0x276   : > { %v1133_v1 = vrot.slane %v1132_v13, 4 }
 0x277   : > { %v1142_v23 = vrot.slane %v1141_v54, 4 }
 0x278   : > { %v1134_v9 = vadd.f32 %v1133_v1, %v1132_v13 }
 0x279   : > { %v1143_v34 = vadd.f32 %v1142_v23, %v1141_v54 }
 0x27a   : > { %v1135_v17 = vrot.slane %v1134_v9, 2 }
 0x27b   : > { %v1144_v30 = vrot.slane %v1143_v34, 2 }
 0x27c   : > { %v1136_v43 = vadd.f32 %v1135_v17, %v1134_v9 }
 0x27d   : > { %v1145_v24 = vadd.f32 %v1144_v30, %v1143_v34 }
 0x27e   : > { %v1137_v41 = vrot.slane %v1136_v43, 1 }
 0x27f   : > { %v1146_v14 = vrot.slane %v1145_v24, 1 }
 0x280   : > { %v1138_v50 = vadd.f32 %v1137_v41, %v1136_v43 }
 0x281   : > { %v1147_v11 = vadd.f32 %v1146_v14, %v1145_v24 }
 0x283   : > { %v1150_v55 = vcombine.low %v1138_v50, %v1147_v11 }
 0x285   : > { %v1157_v10 = vrot.slane %v1150_v55, %v2107_v7 }
 0x287   : > { %v1164_v20 = vrot.slane %v1157_v10, %v2107_v7 }
 0x289   : > { %1166 = vst.msk [vmem:[%s332_s9] sm:$0x3] %vm2134_vm7, %v1164_v20 }
 0x28a PF: > { %s17_s23 = sadd.s32 1, %s1529_s23   ;;  %s2269_s21 = smov %s1525_s22 }
 0x28b   : > { %p14_p5 = scmp.ge.s32.totalorder %s17_s23, 4   ;;  %s2270_s22 = smov %s2272_s24 }
 0x28d   :  { %16 = sbr.rel (!%p14_p5) target bundleno = 2 (0x2), region = 90 }

</bundles_post_ra>
